<compile_context>
chip_gen: v7x
topology: tpu7x:2x2x1
jax: 0.10.0
libtpu: 0.0.40
codegen_flags: <defaults>
</compile_context>

<pallas_src>
import functools

import jax
import jax.numpy as jnp
from jax import lax
from jax.experimental import pallas as pl
from jax.experimental.pallas import tpu as pltpu


def prepare_head_weights(wq, wk, wv):
    """One-time weight prep (model-setup time, NOT per forward call).

    Fuses [Wq | Wk | Wv] into a single (C, 3*h_pad) bf16 matrix, zero-padding each
    head chunk to a 128-lane boundary and folding the 1/sqrt(head_size) score
    scale into the Wq columns.
    """
    C, H = wq.shape
    h_pad = ((H + 127) // 128) * 128
    scale = float(H) ** -0.5

    def _pad(w):
        return jnp.pad(w, ((0, 0), (0, h_pad - H)))

    w_fused = jnp.concatenate([_pad(wq * scale), _pad(wk), _pad(wv)], axis=1)
    return w_fused.astype(jnp.bfloat16)


def _head_kernel(x_ref, w_ref, o_ref, *, bb):
    # x_ref: (bb*T, C)      bf16   rows for `bb` batch elements, flattened
    # w_ref: (C, 3*h_pad)   bf16   fused [Wq*scale | Wk | Wv], lane-padded
    # o_ref: (bb*T, h_pad)  f32    lane-dense (padded) output
    t = x_ref.shape[0] // bb
    h_pad = o_ref.shape[1]

    x = x_ref[...]
    w = w_ref[...]

    # Fused QKV projection for all bb*T rows in one MXU matmul (f32 accumulation);
    # single cast of the result to bf16 for the downstream matmuls.
    qkv = jnp.dot(x, w, preferred_element_type=jnp.float32).astype(jnp.bfloat16)

    # Causal mask is identical for every batch element -> build once, outside loop.
    row = lax.broadcasted_iota(jnp.int32, (t, t), 0)
    col = lax.broadcasted_iota(jnp.int32, (t, t), 1)
    causal = col <= row

    # Static (unrolled) loop over the batch elements handled by this grid step.
    for b in range(bb):
        r0 = b * t
        q = qkv[r0:r0 + t, 0:h_pad]            # (T, h_pad) bf16, scale pre-folded
        k = qkv[r0:r0 + t, h_pad:2 * h_pad]    # (T, h_pad) bf16
        v = qkv[r0:r0 + t, 2 * h_pad:]         # (T, h_pad) bf16
        # Padded lanes of q/k/v are exactly zero -> contractions are unaffected.

        # q @ k^T without materializing a transpose: contract the last dims.
        wei = lax.dot_general(
            q, k, dimension_numbers=(((1,), (1,)), ((), ())),
            preferred_element_type=jnp.float32)                    # (T, T) f32

        # Causal mask; -1e30 ~ -inf for the softmax (diagonal is never masked).
        wei = jnp.where(causal, wei, jnp.float32(-1e30))

        # Numerically stable softmax (f32); reciprocal on the EUP slot.
        m = jnp.max(wei, axis=-1, keepdims=True)
        e = jnp.exp(wei - m)
        s = jnp.sum(e, axis=-1, keepdims=True)
        p = e * pl.reciprocal(s, approx=True)

        # dropout(p) -> identity in eval mode.

        out = jnp.dot(p.astype(jnp.bfloat16), v,
                      preferred_element_type=jnp.float32)          # (T, h_pad) f32
        o_ref[r0:r0 + t, :] = out.astype(o_ref.dtype)


def _default_batch_per_step(B):
    """Grid policy: collapse the batch grid to one step on single-TensorCore chips
    (v5e/v6e — per-grid-step overhead dwarfs the ~35 MFLOP of compute); keep a
    parallel grid axis of length >= 2 on multi-TensorCore chips (v7x) so both
    cores get independent work. Either choice is numerically identical."""
    try:
        kind = jax.devices()[0].device_kind.lower()
    except Exception:
        kind = ""
    multi_tc = ("v7" in kind) or ("7x" in kind)
    if multi_tc and B >= 2:
        return 1
    return B


def head_forward(x, w_fused, head_size, *, batch_per_step=None, return_padded=False):
    """x: (B, T, C) f32; w_fused: prepared (C, 3*h_pad) bf16 -> (B, T, head_size) f32."""
    B, T, C = x.shape
    h_pad = w_fused.shape[1] // 3

    bb = _default_batch_per_step(B) if batch_per_step is None else batch_per_step
    assert B % bb == 0, "batch_per_step must divide B"

    # Flatten (B, T) -> rows once in the wrapper (free XLA reshape) so every
    # in-kernel op is a plain 2-D tile op.
    x2 = x.astype(jnp.bfloat16).reshape(B * T, C)

    out2 = pl.pallas_call(
        functools.partial(_head_kernel, bb=bb),
        out_shape=jax.ShapeDtypeStruct((B * T, h_pad), jnp.float32),
        grid_spec=pltpu.PrefetchScalarGridSpec(
            num_scalar_prefetch=0,
            grid=(B // bb,),
            in_specs=[
                pl.BlockSpec((bb * T, C), lambda i: (i, 0)),
                pl.BlockSpec((C, 3 * h_pad), lambda i: (0, 0)),
            ],
            out_specs=pl.BlockSpec((bb * T, h_pad), lambda i: (i, 0)),
        ),
        compiler_params=pltpu.CompilerParams(
            # Batch-block axis is independent -> megacore-shardable on v7x.
            dimension_semantics=("parallel",),
        ),
    )(x2, w_fused)

    out = out2.reshape(B, T, h_pad)
    if return_padded:
        return out                      # lane-dense layout for fused consumers
    return out[..., :head_size]


def head_reference_f32(x, wq, wk, wv):
    """Pure-JAX f32 reference mirroring the PyTorch forward (eval mode)."""
    T = x.shape[1]
    H = wq.shape[1]
    q = x @ wq
    k = x @ wk
    v = x @ wv
    wei = jnp.einsum("btd,bsd->bts", q, k) * (H ** -0.5)
    tril = jnp.tril(jnp.ones((T, T), dtype=bool))
    wei = jnp.where(tril[None, :, :], wei, -jnp.inf)
    wei = jax.nn.softmax(wei, axis=-1)
    return jnp.einsum("bts,bsh->bth", wei, v)


def head_reference_mixed(x, w_fused, head_size):
    """Reference mirroring the kernel's bf16-operand / f32-accumulate matmuls
    (same fused, scale-folded, lane-padded weight)."""
    T = x.shape[1]
    h_pad = w_fused.shape[1] // 3
    xb = x.astype(jnp.bfloat16)
    qkv = jnp.einsum("btc,cf->btf", xb, w_fused,
                     preferred_element_type=jnp.float32).astype(jnp.bfloat16)
    q = qkv[..., 0:h_pad]
    k = qkv[..., h_pad:2 * h_pad]
    v = qkv[..., 2 * h_pad:]
    wei = jnp.einsum("bqd,bkd->bqk", q, k, preferred_element_type=jnp.float32)
    tril = jnp.tril(jnp.ones((T, T), dtype=bool))
    wei = jnp.where(tril[None, :, :], wei, -jnp.inf)
    p = jax.nn.softmax(wei, axis=-1)
    out = jnp.einsum("bqk,bkd->bqd", p.astype(jnp.bfloat16), v,
                     preferred_element_type=jnp.float32)
    return out[..., :head_size]


if __name__ == "__main__":
    # Shapes consistent with the module: block_size=64, n_embd=320,
    # head_size = n_embd // n_head = 320 // 6 = 53.
    B, T, C, H = 2, 64, 320, 53

    key = jax.random.PRNGKey(0)
    kx, kq, kk, kv = jax.random.split(key, 4)

    x = jax.random.normal(kx, (B, T, C), dtype=jnp.float32)
    # torch nn.Linear default init: U(-1/sqrt(C), 1/sqrt(C))
    bound = 1.0 / (C ** 0.5)
    wq = jax.random.uniform(kq, (C, H), jnp.float32, -bound, bound)
    wk = jax.random.uniform(kk, (C, H), jnp.float32, -bound, bound)
    wv = jax.random.uniform(kv, (C, H), jnp.float32, -bound, bound)

    # One-time (model-setup) weight prep: fuse + pad + fold scale + bf16 cast.
    w_fused = prepare_head_weights(wq, wk, wv)

    # Default grid policy (chip-dependent, numerics-identical either way).
    out = head_forward(x, w_fused, H)
    out = jax.block_until_ready(out)
    assert out.shape == (B, T, H)

    # Exercise both grid layouts explicitly (collapsed 1-step vs per-batch steps);
    # they run the same math and must agree.
    out_collapsed = jax.block_until_ready(head_forward(x, w_fused, H, batch_per_step=B))
    out_per_batch = jax.block_until_ready(head_forward(x, w_fused, H, batch_per_step=1))
    assert jnp.allclose(out_collapsed, out_per_batch, atol=1e-4, rtol=1e-4), \
        "grid-layout variants disagree"

    # Tight check against a reference that mirrors the kernel's mixed precision.
    ref_mixed = head_reference_mixed(x, w_fused, H)
    assert jnp.allclose(out, ref_mixed, atol=1e-2, rtol=1e-2), \
        "mismatch vs mixed-precision reference"

    # Semantic check against the exact f32 PyTorch-equivalent math
    # (looser tolerance accounts for bf16 MXU operands + approx reciprocal).
    ref_f32 = head_reference_f32(x, wq, wk, wv)
    assert jnp.allclose(out, ref_f32, atol=5e-2, rtol=5e-2), \
        "mismatch vs f32 reference"

    print("KERNEL_OK")
</pallas_src>

<mosaic_0001>
module attributes {stable_mosaic.version = 11 : i64} {
  func.func @_head_kernel(%arg0: i32, %arg1: memref<128x320xbf16, #tpu.memory_space<vmem>>, %arg2: memref<320x384xbf16, #tpu.memory_space<vmem>>, %arg3: memref<128x128xf32, #tpu.memory_space<vmem>>) attributes {dimension_semantics = [#tpu.dimension_semantics<parallel>], iteration_bounds = array<i64: 1>, scalar_prefetch = 0 : i64, scratch_operands = 0 : i64, tpu.core_type = #tpu.core_type<tc>, window_params = [{transform_indices = @transform_0, window_bounds = array<i64: 128, 320>}, {pipeline_mode = #tpu.pipeline_mode<synchronous>, transform_indices = @transform_1, window_bounds = array<i64: 320, 384>}, {transform_indices = @transform_2, window_bounds = array<i64: 128, 128>}]} {
    %c0 = arith.constant 0 : index
    %c0_0 = arith.constant 0 : index
    %0 = vector.load %arg1[%c0, %c0_0] : memref<128x320xbf16, #tpu.memory_space<vmem>>, vector<128x320xbf16>
    %c0_1 = arith.constant 0 : index
    %c0_2 = arith.constant 0 : index
    %1 = vector.load %arg2[%c0_1, %c0_2] : memref<320x384xbf16, #tpu.memory_space<vmem>>, vector<320x384xbf16>
    %cst = arith.constant dense<0.000000e+00> : vector<128x384xf32>
    %2 = tpu.matmul %0, %1, %cst {dimension_numbers = #tpu.dot_dimension_numbers<[1], [0], [0], [1], [0, 0, 1, 1], [], []>} : vector<128x320xbf16>, vector<320x384xbf16>, vector<128x384xf32> -> vector<128x384xf32>
    %3 = arith.truncf %2 : vector<128x384xf32> to vector<128x384xbf16>
    %4 = tpu.iota {dimensions = array<i32: 0>} : vector<64x64xi32>
    %5 = tpu.iota {dimensions = array<i32: 1>} : vector<64x64xi32>
    %6 = arith.cmpi sle, %5, %4 : vector<64x64xi32>
    %7 = vector.extract_strided_slice %3 {offsets = [0, 0], sizes = [64, 128], strides = [1, 1]} : vector<128x384xbf16> to vector<64x128xbf16>
    %8 = vector.extract_strided_slice %3 {offsets = [0, 128], sizes = [64, 128], strides = [1, 1]} : vector<128x384xbf16> to vector<64x128xbf16>
    %9 = vector.extract_strided_slice %3 {offsets = [0, 256], sizes = [64, 128], strides = [1, 1]} : vector<128x384xbf16> to vector<64x128xbf16>
    %cst_3 = arith.constant dense<0.000000e+00> : vector<64x64xf32>
    %10 = tpu.matmul %7, %8, %cst_3 {dimension_numbers = #tpu.dot_dimension_numbers<[1], [1], [0], [0], [0, 0, 1, 0], [], []>} : vector<64x128xbf16>, vector<64x128xbf16>, vector<64x64xf32> -> vector<64x64xf32>
    %cst_4 = arith.constant -1.000000e+30 : f32
    %11 = vector.broadcast %cst_4 : f32 to vector<64x64xf32>
    %12 = arith.select %6, %10, %11 : vector<64x64xi1>, vector<64x64xf32>
    %cst_5 = arith.constant dense<0xFF800000> : vector<64xf32>
    %13 = vector.multi_reduction <maximumf>, %12, %cst_5 [1] : vector<64x64xf32> to vector<64xf32>
    %14 = vector.shape_cast %13 : vector<64xf32> to vector<64x1xf32>
    %15 = vector.broadcast %14 : vector<64x1xf32> to vector<64x64xf32>
    %16 = arith.subf %12, %15 : vector<64x64xf32>
    %17 = math.exp %16 : vector<64x64xf32>
    %cst_6 = arith.constant dense<0.000000e+00> : vector<64xf32>
    %18 = vector.multi_reduction <add>, %17, %cst_6 [1] : vector<64x64xf32> to vector<64xf32>
    %19 = vector.shape_cast %18 : vector<64xf32> to vector<64x1xf32>
    %20 = tpu.reciprocal %19 {approx = true} : vector<64x1xf32> -> vector<64x1xf32>
    %21 = vector.broadcast %20 : vector<64x1xf32> to vector<64x64xf32>
    %22 = arith.mulf %17, %21 : vector<64x64xf32>
    %23 = arith.truncf %22 : vector<64x64xf32> to vector<64x64xbf16>
    %cst_7 = arith.constant dense<0.000000e+00> : vector<64x128xf32>
    %24 = tpu.matmul %23, %9, %cst_7 {dimension_numbers = #tpu.dot_dimension_numbers<[1], [0], [0], [1], [0, 0, 1, 1], [], []>} : vector<64x64xbf16>, vector<64x128xbf16>, vector<64x128xf32> -> vector<64x128xf32>
    %c0_8 = arith.constant 0 : index
    %c0_9 = arith.constant 0 : index
    %25 = vector.load %arg3[%c0_8, %c0_9] : memref<128x128xf32, #tpu.memory_space<vmem>>, vector<64x128xf32>
    tpu.vector_store %arg3[%c0_8, %c0_9], %24 {strides = array<i32>} : memref<128x128xf32, #tpu.memory_space<vmem>>, vector<64x128xf32>,
    %26 = vector.extract_strided_slice %3 {offsets = [64, 0], sizes = [64, 128], strides = [1, 1]} : vector<128x384xbf16> to vector<64x128xbf16>
    %27 = vector.extract_strided_slice %3 {offsets = [64, 128], sizes = [64, 128], strides = [1, 1]} : vector<128x384xbf16> to vector<64x128xbf16>
    %28 = vector.extract_strided_slice %3 {offsets = [64, 256], sizes = [64, 128], strides = [1, 1]} : vector<128x384xbf16> to vector<64x128xbf16>
    %cst_10 = arith.constant dense<0.000000e+00> : vector<64x64xf32>
    %29 = tpu.matmul %26, %27, %cst_10 {dimension_numbers = #tpu.dot_dimension_numbers<[1], [1], [0], [0], [0, 0, 1, 0], [], []>} : vector<64x128xbf16>, vector<64x128xbf16>, vector<64x64xf32> -> vector<64x64xf32>
    %cst_11 = arith.constant -1.000000e+30 : f32
    %30 = vector.broadcast %cst_11 : f32 to vector<64x64xf32>
    %31 = arith.select %6, %29, %30 : vector<64x64xi1>, vector<64x64xf32>
    %cst_12 = arith.constant dense<0xFF800000> : vector<64xf32>
    %32 = vector.multi_reduction <maximumf>, %31, %cst_12 [1] : vector<64x64xf32> to vector<64xf32>
    %33 = vector.shape_cast %32 : vector<64xf32> to vector<64x1xf32>
    %34 = vector.broadcast %33 : vector<64x1xf32> to vector<64x64xf32>
    %35 = arith.subf %31, %34 : vector<64x64xf32>
    %36 = math.exp %35 : vector<64x64xf32>
    %cst_13 = arith.constant dense<0.000000e+00> : vector<64xf32>
    %37 = vector.multi_reduction <add>, %36, %cst_13 [1] : vector<64x64xf32> to vector<64xf32>
    %38 = vector.shape_cast %37 : vector<64xf32> to vector<64x1xf32>
    %39 = tpu.reciprocal %38 {approx = true} : vector<64x1xf32> -> vector<64x1xf32>
    %40 = vector.broadcast %39 : vector<64x1xf32> to vector<64x64xf32>
    %41 = arith.mulf %36, %40 : vector<64x64xf32>
    %42 = arith.truncf %41 : vector<64x64xf32> to vector<64x64xbf16>
    %cst_14 = arith.constant dense<0.000000e+00> : vector<64x128xf32>
    %43 = tpu.matmul %42, %28, %cst_14 {dimension_numbers = #tpu.dot_dimension_numbers<[1], [0], [0], [1], [0, 0, 1, 1], [], []>} : vector<64x64xbf16>, vector<64x128xbf16>, vector<64x128xf32> -> vector<64x128xf32>
    %c64 = arith.constant 64 : index
    %c0_15 = arith.constant 0 : index
    %44 = vector.load %arg3[%c64, %c0_15] : memref<128x128xf32, #tpu.memory_space<vmem>>, vector<64x128xf32>
    tpu.vector_store %arg3[%c64, %c0_15], %43 {strides = array<i32>} : memref<128x128xf32, #tpu.memory_space<vmem>>, vector<64x128xf32>,
    return
  }
  func.func @transform_0(%arg0: i32) -> (i32, i32) {
    %c0_i32 = arith.constant 0 : i32
    %c0_i32_0 = arith.constant 0 : i32
    return %arg0, %c0_i32 : i32, i32
  }
  func.func @transform_1(%arg0: i32) -> (i32, i32) {
    %c0_i32 = arith.constant 0 : i32
    %c0_i32_0 = arith.constant 0 : i32
    %c0_i32_1 = arith.constant 0 : i32
    return %c0_i32, %c0_i32_0 : i32, i32
  }
  func.func @transform_2(%arg0: i32) -> (i32, i32) {
    %c0_i32 = arith.constant 0 : i32
    %c0_i32_0 = arith.constant 0 : i32
    return %arg0, %c0_i32 : i32, i32
  }
}

</mosaic_0001>

<bundles_post_ra>
// kernel: tpu_custom_call.1
= control target key start
LH: loop header
LB: loop body
LE: loop exit
PB: predicated region body
PF: predicated region fallthrough
CT: control target
= control target key end

     0   :  { %7 = vsyncpa [#allocation3], 0  ;;  %s2520_s0 = inlined_call_operand.vmem [shape: bf16[128,320], index: 0, kind: input, shape index: {}]   ;;  %s2521_s1 = inlined_call_operand.hbm [shape: bf16[320,384], index: 1, kind: input, shape index: {}]   ;;  %s2522_s2 = inlined_call_operand.hbm [shape: f32[128,128], index: 2, kind: output, shape index: {}]  }
   0x1   :  { %8 = vsyncpa [#allocation4], 0  ;;  %s2159_s9 = smov [#allocation2]   ;;  %s2111_s13 = scalar_lea.hbm %s2521_s1, 7680 }
   0x2   :  { %s16_s10 = sshll.u32 %s2159_s9, 4  ;;  %p2112_p0 = scmp.ne.s32.totalorder %s2521_s1, %s2111_s13  ;;  %s17_s10 = int_to_ptr.vmem [resolvable:$true] %s16_s10 }
   0x3   :  { %p2115_p1 = scmp.lt.u32.totalorder %s2111_s13, %s2521_s1 }
   0x5   :  { %p2117_p2 = pnand %p2115_p1, %p2112_p0 }
   0x7   :  { %2120 = shalt.err (!%p2117_p2)
}
   0x8   :  { %s2121_s18 = scalar_lea.vmem %s17_s10, 7680  ;;  %p2126_p4 = scmp.lt.s32.totalorder %s17_s10, %s17_s10 }
   0x9   :  { %p2122_p3 = scmp.ne.s32.totalorder %s17_s10, %s2121_s18  ;;  %p2127_p5 = scmp.lt.s32.totalorder %s2121_s18, %s2121_s18 }
   0xb   :  { %p2128_p6 = por %p2127_p5, %p2126_p4 }
   0xd   :  { %p2129_p7 = pnand %p2128_p6, %p2122_p3 }
   0xf   :  { %2132 = shalt.err (!%p2129_p7)
}
  0x10   :  { %s2160_s19 = smov 192   ;;  %s2161_s20 = smov 12  }
  0x11   :  { %22 = dma.hbm_to_vmem [thread:$0]  %s2521_s1, 7680, %s17_s10, [#allocation3], %s2160_s19, %s2160_s19, %s2161_s20  }
  0x12   :  { %2155 = dma.done.wait [#allocation3], 7680  }
  0x13   :  { %2156 = vsyncadd [#allocation3], 4294959616  ;;  %v1935_v0 = vld [vmem:[#allocation2 + $0x4] ss:$12 sps:$4 sm:$0xff]   ;;  %v1937_v1 = vld [vmem:[#allocation2] ss:$12 sps:$4 sm:$0xff]  }
  0x14   :  { %604 = vmatprep.subr.bf16.mxu0 %v1935_v0  ;;  %v1938_v2 = vld [vmem:[#allocation2 + $0x1c] ss:$12 sps:$4 sm:$0xff]   ;;  %v1940_v3 = vld [vmem:[#allocation2 + $0x18] ss:$12 sps:$4 sm:$0xff]   ;;  %v1941_v4 = vld [vmem:[#allocation2 + $0x34] ss:$12 sps:$4 sm:$0xff]  }
  0x15   :  { %605 = vmatpush1.bf16.msra.mxu0 %v1937_v1  ;;  %v1943_v5 = vld [vmem:[#allocation2 + $0x30] ss:$12 sps:$4 sm:$0xff]   ;;  %v1944_v6 = vld [vmem:[#allocation2 + $0x4c] ss:$12 sps:$4 sm:$0xff]   ;;  %v1946_v7 = vld [vmem:[#allocation2 + $0x48] ss:$12 sps:$4 sm:$0xff]  }
  0x16   :  { %606 = vmatprep.subr.bf16.mxu0 %v1938_v2  ;;  %v1947_v8 = vld [vmem:[#allocation2 + $0x64] ss:$12 sps:$4 sm:$0xff]   ;;  %v1949_v9 = vld [vmem:[#allocation2 + $0x60] ss:$12 sps:$4 sm:$0xff]   ;;  %v1950_v10 = vld [vmem:[#allocation2 + $0x7c] ss:$12 sps:$4 sm:$0xff]  }
  0x17   :  { %v1952_v11 = vld [vmem:[#allocation2 + $0x78] ss:$12 sps:$4 sm:$0xff]   ;;  %v1953_v12 = vld [vmem:[#allocation2 + $0x94] ss:$12 sps:$4 sm:$0xff]   ;;  %v1955_v13 = vld [vmem:[#allocation2 + $0x90] ss:$12 sps:$4 sm:$0xff]  }
  0x18   :  { %v1983_v14 = vld [vmem:[#allocation2 + $0xc8] ss:$12 sps:$4 sm:$0xff]   ;;  %v1956_v15 = vld [vmem:[#allocation2 + $0xac] ss:$12 sps:$4 sm:$0xff]   ;;  %v1986_v16 = vld [vmem:[%s2520_s0 + $0x4] ss:$12 sps:$4 sm:$0xff]  }
  0x19   :  { %607 = vmatpush1.bf16.msra.mxu0 %v1940_v3  ;;  %1692 = vmatprep.subr.bf16.mxu1 %v1983_v14  ;;  %v1987_v17 = vld [vmem:[#allocation2 + $0x8] ss:$12 sps:$4 sm:$0xff]   ;;  %v1959_v19 = vld [vmem:[#allocation2 + $0xc4] ss:$12 sps:$4 sm:$0xff]   ;;  %v1991_v20 = vld [vmem:[#allocation2 + $0xe0] ss:$12 sps:$4 sm:$0xff]  }
  0x1a   :  { %608 = vmatprep.subr.bf16.mxu0 %v1941_v4  ;;  %v1958_v18 = vld [vmem:[#allocation2 + $0xa8] ss:$12 sps:$4 sm:$0xff]   ;;  %636 = vmatprep.mubr.bf16.mxu0 %v1986_v16  ;;  %v1992_v21 = vld [vmem:[#allocation2 + $0x20] ss:$12 sps:$4 sm:$0xff]   ;;  %v1993_v22 = vld [vmem:[#allocation2 + $0xf8] ss:$12 sps:$4 sm:$0xff]  }
  0x1b   :  { %862 = vmatprep.mubr.bf16.mxu1 %v1986_v16  ;;  %1693 = vmatpush3.bf16.msra.mxu1 %v1987_v17  ;;  %v1961_v23 = vld [vmem:[#allocation2 + $0xc0] ss:$12 sps:$4 sm:$0xff]   ;;  %v1996_v24 = vld [vmem:[#allocation2 + $0x38] ss:$12 sps:$4 sm:$0xff]   ;;  %v1962_v25 = vld [vmem:[#allocation2 + $0xdc] ss:$12 sps:$4 sm:$0xff]  }
  0x1c   :  { %1694 = vmatprep.subr.bf16.mxu1 %v1991_v20  ;;  %v1998_v26 = vld [vmem:[#allocation2 + $0x110] ss:$12 sps:$4 sm:$0xff]   ;;  %v1964_v27 = vld [vmem:[#allocation2 + $0xd8] ss:$12 sps:$4 sm:$0xff]   ;;  %v2000_v29 = vld [vmem:[#allocation2 + $0x128] ss:$12 sps:$4 sm:$0xff]  }
  0x1d   :  { %609 = vmatpush1.bf16.msra.mxu0 %v1943_v5  ;;  %v1999_v28 = vld [vmem:[#allocation2 + $0x50] ss:$12 sps:$4 sm:$0xff]   ;;  %v1965_v30 = vld [vmem:[#allocation2 + $0xf4] ss:$12 sps:$4 sm:$0xff]   ;;  %v1968_v34 = vld [vmem:[#allocation2 + $0x10c] ss:$12 sps:$4 sm:$0xff]  }
  0x1e   :  { %610 = vmatprep.subr.bf16.mxu0 %v1944_v6  ;;  %v1967_v31 = vld [vmem:[#allocation2 + $0xf0] ss:$12 sps:$4 sm:$0xff]   ;;  %v2003_v32 = vld [vmem:[#allocation2 + $0x68] ss:$12 sps:$4 sm:$0xff]   ;;  %v2008_v33 = vld [vmem:[#allocation2 + $0x140] ss:$12 sps:$4 sm:$0xff]  }
  0x1f   :  { %1695 = vmatpush3.bf16.msra.mxu1 %v1992_v21  ;;  %v1970_v35 = vld [vmem:[#allocation2 + $0x108] ss:$12 sps:$4 sm:$0xff]   ;;  %v2009_v36 = vld [vmem:[#allocation2 + $0x80] ss:$12 sps:$4 sm:$0xff]   ;;  %v2010_v37 = vld [vmem:[#allocation2 + $0x158] ss:$12 sps:$4 sm:$0xff]  }
  0x20   :  { %1696 = vmatprep.subr.bf16.mxu1 %v1993_v22  ;;  %v1971_v38 = vld [vmem:[#allocation2 + $0x124] ss:$12 sps:$4 sm:$0xff]   ;;  %v1973_v40 = vld [vmem:[#allocation2 + $0x120] ss:$12 sps:$4 sm:$0xff]   ;;  %v1974_v42 = vld [vmem:[#allocation2 + $0x13c] ss:$12 sps:$4 sm:$0xff]  }
  0x21   :  { %611 = vmatpush1.bf16.msra.mxu0 %v1946_v7  ;;  %v2013_v39 = vld [vmem:[#allocation2 + $0x98] ss:$12 sps:$4 sm:$0xff]   ;;  %v2015_v41 = vld [vmem:[#allocation2 + $0x170] ss:$12 sps:$4 sm:$0xff]   ;;  %v1977_v45 = vld [vmem:[#allocation2 + $0x154] ss:$12 sps:$4 sm:$0xff]  }
  0x22   :  { %612 = vmatprep.subr.bf16.mxu0 %v1947_v8  ;;  %v2016_v43 = vld [vmem:[#allocation2 + $0xb0] ss:$12 sps:$4 sm:$0xff]   ;;  %v1976_v44 = vld [vmem:[#allocation2 + $0x138] ss:$12 sps:$4 sm:$0xff]   ;;  %v1984_v48 = vld [vmem:[%s2520_s0] ss:$12 sps:$4 sm:$0xff]  }
  0x23   :  { %1697 = vmatpush3.bf16.msra.mxu1 %v1996_v24  ;;  %v1979_v46 = vld [vmem:[#allocation2 + $0x150] ss:$12 sps:$4 sm:$0xff]   ;;  %v1980_v47 = vld [vmem:[#allocation2 + $0x16c] ss:$12 sps:$4 sm:$0xff]   ;;  %v2037_v50 = vld [vmem:[#allocation2 + $0x188] ss:$12 sps:$4 sm:$0xff]  }
  0x24   :  { %1698 = vmatprep.subr.bf16.mxu1 %v1998_v26  ;;  %v1994_v49 = vld [vmem:[%s2520_s0 + $0x1c] ss:$12 sps:$4 sm:$0xff]   ;;  %v2039_v52 = vld [vmem:[#allocation2 + $0x1a0] ss:$12 sps:$4 sm:$0xff]   ;;  %v1990_v53 = vld [vmem:[#allocation2 + $0x184] ss:$12 sps:$4 sm:$0xff]  }
  0x25   :  { %613 = vmatpush1.bf16.msra.mxu0 %v1949_v9  ;;  %v1982_v51 = vld [vmem:[#allocation2 + $0x168] ss:$12 sps:$4 sm:$0xff]   ;;  %v2040_v54 = vld [vmem:[#allocation2 + $0x1b8] ss:$12 sps:$4 sm:$0xff]   ;;  %v1988_v55 = vld [vmem:[#allocation2 + $0x180] ss:$12 sps:$4 sm:$0xff]  }
  0x26   :  { %614 = vmatprep.subr.bf16.mxu0 %v1950_v10  ;;  %v1997_v56 = vld [vmem:[%s2520_s0 + $0x18] ss:$12 sps:$4 sm:$0xff]   ;;  %v2001_v57 = vld [vmem:[%s2520_s0 + $0x34] ss:$12 sps:$4 sm:$0xff]   ;;  %v2007_v58 = vld [vmem:[#allocation2 + $0x19c] ss:$12 sps:$4 sm:$0xff]  }
  0x27   :  { %1699 = vmatpush3.bf16.msra.mxu1 %v1999_v28  ;;  %v2042_v59 = vld [vmem:[#allocation2 + $0x1d0] ss:$12 sps:$4 sm:$0xff]   ;;  %v2005_v60 = vld [vmem:[#allocation2 + $0x198] ss:$12 sps:$4 sm:$0xff]   ;;  %v2022_v61 = vld [vmem:[#allocation2 + $0x1b4] ss:$12 sps:$4 sm:$0xff]  }
  0x28   :  { %1700 = vmatprep.subr.bf16.mxu1 %v2000_v29  ;;  %v2004_v62 = vld [vmem:[%s2520_s0 + $0x30] ss:$12 sps:$4 sm:$0xff]   ;;  %v2011_v0 = vld [vmem:[%s2520_s0 + $0x4c] ss:$12 sps:$4 sm:$0xff]   ;;  %v2029_v2 = vld [vmem:[#allocation2 + $0x1c8] ss:$12 sps:$4 sm:$0xff]  }
  0x29   :  { %615 = vmatpush1.bf16.msra.mxu0 %v1952_v11  ;;  %v2020_v63 = vld [vmem:[#allocation2 + $0x1b0] ss:$12 sps:$4 sm:$0xff]   ;;  %v2031_v1 = vld [vmem:[#allocation2 + $0x1cc] ss:$12 sps:$4 sm:$0xff]   ;;  %v2014_v3 = vld [vmem:[%s2520_s0 + $0x48] ss:$12 sps:$4 sm:$0xff]  }
  0x2a   :  { %616 = vmatprep.subr.bf16.mxu0 %v1953_v12  ;;  %v2017_v4 = vld [vmem:[%s2520_s0 + $0x64] ss:$12 sps:$4 sm:$0xff]   ;;  %v2019_v5 = vld [vmem:[%s2520_s0 + $0x60] ss:$12 sps:$4 sm:$0xff]   ;;  %v2023_v6 = vld [vmem:[%s2520_s0 + $0x7c] ss:$12 sps:$4 sm:$0xff]  }
  0x2b   :  { %1701 = vmatpush3.bf16.msra.mxu1 %v2003_v32  ;;  %v2025_v7 = vld [vmem:[%s2520_s0 + $0x78] ss:$12 sps:$4 sm:$0xff]   ;;  %v2026_v8 = vld [vmem:[%s2520_s0 + $0x94] ss:$12 sps:$4 sm:$0xff]   ;;  %v2028_v9 = vld [vmem:[%s2520_s0 + $0x90] ss:$12 sps:$4 sm:$0xff]  }
  0x2c   :  { %1702 = vmatprep.subr.bf16.mxu1 %v2008_v33  ;;  %v2032_v10 = vld [vmem:[%s2520_s0 + $0xac] ss:$12 sps:$4 sm:$0xff]   ;;  %v2034_v11 = vld [vmem:[%s2520_s0 + $0xa8] ss:$12 sps:$4 sm:$0xff]   ;;  %vm579_vm0 = vcmask 523264  }
  0x2d   :  { %617 = vmatpush1.bf16.msra.mxu0 %v1955_v13  ;;  %v2035_v12 = vld [vmem:[%s2520_s0 + $0x8] ss:$12 sps:$4 sm:$0xff]   ;;  %v2036_v13 = vld [vmem:[%s2520_s0 + $0x20] ss:$12 sps:$4 sm:$0xff]   ;;  %v2038_v14 = vld [vmem:[%s2520_s0 + $0x38] ss:$12 sps:$4 sm:$0xff]  }
  0x2e   :  { %618 = vmatprep.subr.bf16.mxu0 %v1956_v15  ;;  %v2162_v15 = vmov 0   ;;  %v2041_v16 = vld [vmem:[%s2520_s0 + $0x50] ss:$12 sps:$4 sm:$0xff]   ;;  %v2043_v17 = vld [vmem:[%s2520_s0 + $0x68] ss:$12 sps:$4 sm:$0xff]  }
  0x2f   :  { %1703 = vmatpush3.bf16.msra.mxu1 %v2009_v36  ;;  %v2046_v20 = vld [vmem:[%s2520_s0 + $0xb0] ss:$12 sps:$4 sm:$0xff]  }
  0x30   :  { %1704 = vmatprep.subr.bf16.mxu1 %v2010_v37 }
  0x31   :  { %619 = vmatpush1.bf16.msra.mxu0 %v1958_v18  ;;  %v2044_v18 = vld [vmem:[%s2520_s0 + $0x80] ss:$12 sps:$4 sm:$0xff]  }
  0x32   :  { %620 = vmatprep.subr.bf16.mxu0 %v1959_v19  ;;  %v2045_v19 = vld [vmem:[%s2520_s0 + $0x98] ss:$12 sps:$4 sm:$0xff]   ;;  %s2163_s0 = smov [#allocation5]  }
  0x33   :  { %1705 = vmatpush3.bf16.msra.mxu1 %v2013_v39  ;;  %s1572_s13 = sshll.u32 %s2163_s0, 4  ;;  %s1573_s13 = int_to_ptr.vmem [resolvable:$true] %s1572_s13 }
  0x34   :  { %1706 = vmatprep.subr.bf16.mxu1 %v2015_v41  ;;  %s2133_s14 = scalar_lea.vmem %s1573_s13, 2048  ;;  %p2138_p9 = scmp.lt.s32.totalorder %s1573_s13, %s1573_s13 }
  0x35   :  { %621 = vmatpush1.bf16.msra.mxu0 %v1961_v23  ;;  %p2134_p8 = scmp.ne.s32.totalorder %s1573_s13, %s2133_s14  ;;  %p2139_p10 = scmp.lt.s32.totalorder %s2133_s14, %s2133_s14 }
  0x36   :  { %622 = vmatprep.subr.bf16.mxu0 %v1962_v25 }
  0x37   :  { %1707 = vmatpush3.bf16.msra.mxu1 %v2016_v43  ;;  %p2140_p11 = por %p2139_p10, %p2138_p9 }
  0x38   :  { %1800 = vmatprep.subr.bf16.mxu1 %v2037_v50 }
  0x39   :  { %623 = vmatpush1.bf16.msra.mxu0 %v1964_v27  ;;  %p2141_p12 = pnand %p2140_p11, %p2134_p8 }
  0x3a   :  { %624 = vmatprep.subr.bf16.mxu0 %v1965_v30  ;;  %863 = vmatmul.mubr.bf16.vlgmr.msra.gmra.mrb[0].mxu1 %v1984_v48 }
  0x3b   :  { %870 = vmatprep.mubr.bf16.mxu1 %v1994_v49  ;;  %1801 = vmatpush3.bf16.msra.mxu1 %v2037_v50 }
  0x3c   :  { %1802 = vmatprep.subr.bf16.mxu1 %v2039_v52 }
  0x3d   :  { %625 = vmatpush1.bf16.msra.mxu0 %v1967_v31 }
  0x3e   :  { %626 = vmatprep.subr.bf16.mxu0 %v1968_v34 }
  0x3f   :  { %1803 = vmatpush3.bf16.msra.mxu1 %v2039_v52 }
  0x40   :  { %1804 = vmatprep.subr.bf16.mxu1 %v2040_v54 }
  0x41   :  { %627 = vmatpush1.bf16.msra.mxu0 %v1970_v35 }
  0x42   :  { %628 = vmatprep.subr.bf16.mxu0 %v1971_v38  ;;  %871 = vmatmul.mubr.bf16.gmra.mrb[4].mxu1 %v1997_v56 }
  0x43   :  { %878 = vmatprep.mubr.bf16.mxu1 %v2001_v57  ;;  %1805 = vmatpush3.bf16.msra.mxu1 %v2040_v54 }
  0x44   :  { %1806 = vmatprep.subr.bf16.mxu1 %v2042_v59 }
  0x45   :  { %629 = vmatpush1.bf16.msra.mxu0 %v1973_v40 }
  0x46   :  { %630 = vmatprep.subr.bf16.mxu0 %v1974_v42 }
  0x47   :  { %1807 = vmatpush3.bf16.msra.mxu1 %v2042_v59 }
  0x49   :  { %631 = vmatpush1.bf16.msra.mxu0 %v1976_v44 }
  0x4a   :  { %632 = vmatprep.subr.bf16.mxu0 %v1977_v45  ;;  %879 = vmatmul.mubr.bf16.gmra.mrb[8].mxu1 %v2004_v62 }
  0x4b   :  { %886 = vmatprep.mubr.bf16.mxu1 %v2011_v0 }
  0x4d   :  { %633 = vmatpush1.bf16.msra.mxu0 %v1979_v46 }
  0x4e   :  { %634 = vmatprep.subr.bf16.mxu0 %v1980_v47 }
  0x51   :  { %635 = vmatpush1.bf16.msra.mxu0 %v1982_v51 }
  0x52   :  { %717 = vmatprep.subr.bf16.mxu0 %v1990_v53  ;;  %887 = vmatmul.mubr.bf16.gmra.mrb[12].mxu1 %v2014_v3 }
  0x53   :  { %894 = vmatprep.mubr.bf16.mxu1 %v2017_v4 }
  0x54   :  { %637 = vmatmul.mubr.bf16.vlgmr.msra.gmra.mrb[0].mxu0 %v1984_v48 }
  0x55   :  { %718 = vmatpush1.bf16.msra.mxu0 %v1988_v55  ;;  %646 = vmatprep.mubr.bf16.mxu0 %v1994_v49 }
  0x56   :  { %719 = vmatprep.subr.bf16.mxu0 %v2007_v58 }
  0x59   :  { %720 = vmatpush1.bf16.msra.mxu0 %v2005_v60 }
  0x5a   :  { %721 = vmatprep.subr.bf16.mxu0 %v2022_v61  ;;  %895 = vmatmul.mubr.bf16.gmra.mrb[16].mxu1 %v2019_v5 }
  0x5b   :  { %902 = vmatprep.mubr.bf16.mxu1 %v2023_v6 }
  0x5c   :  { %647 = vmatmul.mubr.bf16.gmra.mrb[4].mxu0 %v1997_v56 }
  0x5d   :  { %656 = vmatprep.mubr.bf16.mxu0 %v2001_v57  ;;  %722 = vmatpush1.bf16.msra.mxu0 %v2020_v63 }
  0x5e   :  { %723 = vmatprep.subr.bf16.mxu0 %v2031_v1 }
  0x61   :  { %724 = vmatpush1.bf16.msra.mxu0 %v2029_v2 }
  0x62   :  { %903 = vmatmul.mubr.bf16.gmra.mrb[20].mxu1 %v2025_v7 }
  0x63   :  { %910 = vmatprep.mubr.bf16.mxu1 %v2026_v8 }
  0x64   :  { %657 = vmatmul.mubr.bf16.gmra.mrb[8].mxu0 %v2004_v62 }
  0x65   :  { %666 = vmatprep.mubr.bf16.mxu0 %v2011_v0 }
  0x6a   :  { %911 = vmatmul.mubr.bf16.gmra.mrb[24].mxu1 %v2028_v9 }
  0x6b   :  { %918 = vmatprep.mubr.bf16.mxu1 %v2032_v10 }
  0x6c   :  { %667 = vmatmul.mubr.bf16.gmra.mrb[12].mxu0 %v2014_v3 }
  0x6d   :  { %676 = vmatprep.mubr.bf16.mxu0 %v2017_v4 }
  0x72   :  { %919 = vmatmul.mubr.bf16.gmra.mrb[28].mxu1 %v2034_v11 }
  0x73   :  { %1808 = vmatprep.mubr.msk.bf16.mxu1 %vm579_vm0, %v2035_v12 }
  0x74   :  { %677 = vmatmul.mubr.bf16.gmra.mrb[16].mxu0 %v2019_v5 }
  0x75   :  { %686 = vmatprep.mubr.bf16.mxu0 %v2023_v6 }
  0x7a   :  { %1809 = vmatmul.mubr.msk.bf16.vlgmr.msra.gmra.mrb[32].mxu1 %vm579_vm0, %v2036_v13 }
  0x7b   :  { %1812 = vmatprep.mubr.msk.bf16.mxu1 %vm579_vm0, %v2038_v14 }
  0x7c   :  { %687 = vmatmul.mubr.bf16.gmra.mrb[20].mxu0 %v2025_v7 }
  0x7d   :  { %696 = vmatprep.mubr.bf16.mxu0 %v2026_v8 }
  0x82   :  { %1813 = vmatmul.mubr.msk.bf16.gmra.mrb[36].mxu1 %vm579_vm0, %v2041_v16 }
  0x83   :  { %1816 = vmatprep.mubr.msk.bf16.mxu1 %vm579_vm0, %v2043_v17 }
  0x84   :  { %697 = vmatmul.mubr.bf16.gmra.mrb[24].mxu0 %v2028_v9 }
  0x85   :  { %706 = vmatprep.mubr.bf16.mxu0 %v2032_v10 }
  0x8a   :  { %1817 = vmatmul.mubr.msk.bf16.gmra.mrb[40].mxu1 %vm579_vm0, %v2044_v18 }
  0x8b   :  { %1820 = vmatprep.mubr.msk.bf16.mxu1 %vm579_vm0, %v2045_v19 }
  0x8c   :  { %707 = vmatmul.mubr.bf16.gmra.mrb[28].mxu0 %v2034_v11 }
  0x8d   :  { %749 = vmatprep.mubr.bf16.mxu0 %v2162_v15 }
  0x92   :  { %1821 = vmatmul.mubr.msk.bf16.gmra.mrb[44].mxu1 %vm579_vm0, %v2046_v20 }
  0x94   :  { %1668 = vmatmul.mubr.msk.bf16.vlgmr.msra.gmra.mrb[0].mxu0 %vm579_vm0, %v2035_v12 }
  0x95   :  { %759 = vmatprep.mubr.bf16.mxu0 %v2162_v15 }
  0x9c   :  { %1669 = vmatmul.mubr.msk.bf16.gmra.mrb[4].mxu0 %vm579_vm0, %v2036_v13 }
  0x9d   :  { %769 = vmatprep.mubr.bf16.mxu0 %v2162_v15 }
  0xa4   :  { %1670 = vmatmul.mubr.msk.bf16.gmra.mrb[8].mxu0 %vm579_vm0, %v2038_v14 }
  0xa5   :  { %779 = vmatprep.mubr.bf16.mxu0 %v2162_v15 }
  0xac   :  { %1671 = vmatmul.mubr.msk.bf16.gmra.mrb[12].mxu0 %vm579_vm0, %v2041_v16 }
  0xad   :  { %789 = vmatprep.mubr.bf16.mxu0 %v2162_v15 }
  0xb4   :  { %1672 = vmatmul.mubr.msk.bf16.gmra.mrb[16].mxu0 %vm579_vm0, %v2043_v17 }
  0xb5   :  { %799 = vmatprep.mubr.bf16.mxu0 %v2162_v15 }
  0xbc   :  { %1673 = vmatmul.mubr.msk.bf16.gmra.mrb[20].mxu0 %vm579_vm0, %v2044_v18 }
  0xbd   :  { %809 = vmatprep.mubr.bf16.mxu0 %v2162_v15 }
  0xc4   :  { %1674 = vmatmul.mubr.msk.bf16.gmra.mrb[24].mxu0 %vm579_vm0, %v2045_v19 }
  0xc5   :  { %819 = vmatprep.mubr.bf16.mxu0 %v2162_v15 }
  0xcc   :  { %1675 = vmatmul.mubr.msk.bf16.gmra.mrb[28].mxu0 %vm579_vm0, %v2046_v20 }
 0x10d   :  { %v1708_v21 = vpop.f32.mrb[0].mxu1 }
 0x10e   :  { %v1709_v22 = vpop.f32.mrb[1].mxu1 }
 0x10f   :  { %v1710_v23 = vadd.f32 %v1709_v22, %v1708_v21  ;;  %v1711_v24 = vpop.f32.mrb[2].mxu1 }
 0x110   :  { %v1712_v25 = vpop.f32.mrb[3].mxu1 }
 0x111   :  { %v1713_v26 = vadd.f32 %v1712_v25, %v1711_v24 }
 0x115   :  { %v1714_v27 = vpop.f32.mrb[4].mxu1 }
 0x116   :  { %v1715_v28 = vpop.f32.mrb[5].mxu1 }
 0x117   :  { %v1716_v29 = vadd.f32 %v1715_v28, %v1714_v27  ;;  %v1717_v30 = vpop.f32.mrb[6].mxu1 }
 0x118   :  { %v1718_v31 = vpop.f32.mrb[7].mxu1 }
 0x119   :  { %v1719_v32 = vadd.f32 %v1718_v31, %v1717_v30 }
 0x11d   :  { %v1720_v33 = vpop.f32.mrb[8].mxu1 }
 0x11e   :  { %v1721_v34 = vpop.f32.mrb[9].mxu1 }
 0x11f   :  { %v1722_v35 = vadd.f32 %v1721_v34, %v1720_v33  ;;  %v1723_v36 = vpop.f32.mrb[10].mxu1 }
 0x120   :  { %v1724_v37 = vpop.f32.mrb[11].mxu1 }
 0x121   :  { %v1725_v38 = vadd.f32 %v1724_v37, %v1723_v36 }
 0x125   :  { %v1726_v39 = vpop.f32.mrb[12].mxu1 }
 0x126   :  { %v1727_v40 = vpop.f32.mrb[13].mxu1 }
 0x127   :  { %v1728_v41 = vadd.f32 %v1727_v40, %v1726_v39  ;;  %v1729_v42 = vpop.f32.mrb[14].mxu1 }
 0x128   :  { %v1730_v43 = vpop.f32.mrb[15].mxu1 }
 0x129   :  { %v1731_v44 = vadd.f32 %v1730_v43, %v1729_v42 }
 0x12d   :  { %v1732_v45 = vpop.f32.mrb[16].mxu1 }
 0x12e   :  { %v1733_v46 = vpop.f32.mrb[17].mxu1 }
 0x12f   :  { %v1734_v47 = vadd.f32 %v1733_v46, %v1732_v45  ;;  %v1735_v48 = vpop.f32.mrb[18].mxu1 }
 0x130   :  { %v1736_v49 = vpop.f32.mrb[19].mxu1 }
 0x131   :  { %v1737_v50 = vadd.f32 %v1736_v49, %v1735_v48 }
 0x135   :  { %v1738_v51 = vpop.f32.mrb[20].mxu1 }
 0x136   :  { %v1739_v52 = vpop.f32.mrb[21].mxu1 }
 0x137   :  { %v1740_v53 = vadd.f32 %v1739_v52, %v1738_v51  ;;  %v1741_v54 = vpop.f32.mrb[22].mxu1 }
 0x138   :  { %v1742_v55 = vpop.f32.mrb[23].mxu1 }
 0x139   :  { %v1743_v56 = vadd.f32 %v1742_v55, %v1741_v54 }
 0x13d   :  { %v1744_v57 = vpop.f32.mrb[24].mxu1 }
 0x13e   :  { %v1745_v58 = vpop.f32.mrb[25].mxu1 }
 0x13f   :  { %v2281_v59 = vadd.f32 %v1745_v58, %v1744_v57  ;;  %v1747_v60 = vpop.f32.mrb[26].mxu1 }
 0x140   :  { %v1748_v61 = vpop.f32.mrb[27].mxu1 }
 0x141   :  { %v2283_v62 = vadd.f32 %v1748_v61, %v1747_v60 }
 0x145   :  { %v1750_v63 = vpop.f32.mrb[28].mxu1 }
 0x146   :  { %v1751_v0 = vpop.f32.mrb[29].mxu1 }
 0x147   :  { %v1752_v1 = vadd.f32 %v1751_v0, %v1750_v63  ;;  %v1753_v2 = vpop.f32.mrb[30].mxu1 }
 0x148   :  { %v1754_v3 = vpop.f32.mrb[31].mxu1 }
 0x149   :  { %v1755_v4 = vadd.f32 %v1754_v3, %v1753_v2 }
 0x14d   :  { %v1810_v5 = vpop.f32.mrb[32].mxu1 }
 0x14e   :  { %v970_v6 = vadd.f32 %v1810_v5, %v1716_v29  ;;  %v961_v7 = vpop.f32.mrb[33].mxu1 }
 0x14f   :  { %v962_v8 = vadd.f32 %v1710_v23, %v961_v7  ;;  %v1811_v9 = vpop.f32.mrb[34].mxu1 }
 0x150   :  { %v973_v10 = vadd.f32 %v1811_v9, %v1719_v32  ;;  %v964_v11 = vpop.f32.mrb[35].mxu1 }
 0x151   :  { %v965_v12 = vadd.f32 %v1713_v26, %v964_v11 }
 0x152   :  { %v2285_v13 = vpack.c.bf16 %v973_v10, %v970_v6 }
 0x153   :  { %v2287_v14 = vpack.c.bf16 %v965_v12, %v962_v8 }
 0x155   :  { %v1814_v15 = vpop.f32.mrb[36].mxu1 }
 0x156   :  { %v986_v17 = vadd.f32 %v1814_v15, %v1728_v41  ;;  %v977_v18 = vpop.f32.mrb[37].mxu1 }
 0x157   :  { %v978_v20 = vadd.f32 %v1722_v35, %v977_v18  ;;  %v1815_v21 = vpop.f32.mrb[38].mxu1 }
 0x158   :  { %v989_v24 = vadd.f32 %v1815_v21, %v1731_v44  ;;  %v980_v25 = vpop.f32.mrb[39].mxu1 }
 0x159   :  { %v981_v28 = vadd.f32 %v1725_v38, %v980_v25 }
 0x15a   :  { %v2289_v30 = vpack.c.bf16 %v989_v24, %v986_v17 }
 0x15b   :  { %v2291_v26 = vpack.c.bf16 %v981_v28, %v978_v20 }
 0x15d   :  { %v1818_v31 = vpop.f32.mrb[40].mxu1 }
 0x15e   :  { %v1002_v33 = vadd.f32 %v1818_v31, %v1740_v53  ;;  %v993_v34 = vpop.f32.mrb[41].mxu1 }
 0x15f   :  { %v994_v36 = vadd.f32 %v1734_v47, %v993_v34  ;;  %v1819_v37 = vpop.f32.mrb[42].mxu1 }
 0x160   :  { %v1005_v40 = vadd.f32 %v1819_v37, %v1743_v56  ;;  %v996_v41 = vpop.f32.mrb[43].mxu1 }
 0x161   :  { %v997_v43 = vadd.f32 %v1737_v50, %v996_v41 }
 0x162   :  { %v2293_v45 = vpack.c.bf16 %v1005_v40, %v1002_v33 }
 0x163   :  { %v2295_v46 = vpack.c.bf16 %v997_v43, %v994_v36 }
 0x165   :  { %1872 = vmatprep.subr.bf16.mxu0 %v2295_v46  ;;  %v1822_v48 = vpop.f32.mrb[44].mxu1 }
 0x166   :  { %1873 = vmatpush3.bf16.msra.mxu0 %v2295_v46  ;;  %v1018_v47 = vadd.f32 %v1822_v48, %v1752_v1  ;;  %v1009_v51 = vpop.f32.mrb[45].mxu1 }
 0x167   :  { %v751_v16 = vpop.f32.mrb[0].mxu0  ;;  %1874 = vmatprep.subr.bf16.mxu0 %v2293_v45  ;;  %v1010_v50 = vadd.f32 %v2281_v59, %v1009_v51  ;;  %v1823_v53 = vpop.f32.mrb[46].mxu1 }
 0x168   :  { %v753_v19 = vpop.f32.mrb[1].mxu0  ;;  %v1021_v55 = vadd.f32 %v1823_v53, %v1755_v4  ;;  %v1012_v56 = vpop.f32.mrb[47].mxu1 }
 0x169   :  { %v755_v22 = vpop.f32.mrb[2].mxu0  ;;  %v1013_v60 = vadd.f32 %v2283_v62, %v1012_v56 }
 0x16a   :  { %v1024_v27 = vpack.c.bf16 %v755_v22, %v751_v16  ;;  %v757_v23 = vpop.f32.mrb[3].mxu0  ;;  %1875 = vmatpush3.bf16.msra.mxu0 %v2293_v45  ;;  %v2303_v63 = vpack.c.bf16 %v1021_v55, %v1018_v47 }
 0x16b   :  { %v1025_v29 = vpack.c.bf16 %v757_v23, %v753_v19  ;;  %v2305_v0 = vpack.c.bf16 %v1013_v60, %v1010_v50 }
 0x16c   :  { %1832 = vmatprep.mubr.bf16.mxu1 %v1024_v27 }
 0x16d   :  { %1824 = vmatprep.subr.bf16.mxu1 %v1025_v29  ;;  %1876 = vmatprep.subr.bf16.mxu0 %v2305_v0 }
 0x16e   :  { %1825 = vmatpush3.bf16.xpose.msra.mxu1 %v1025_v29  ;;  %1877 = vmatpush3.bf16.msra.mxu0 %v2305_v0 }
 0x16f   :  { %v761_v32 = vpop.f32.mrb[4].mxu0  ;;  %1878 = vmatprep.subr.bf16.mxu0 %v2303_v63 }
 0x170   :  { %v763_v35 = vpop.f32.mrb[5].mxu0 }
 0x171   :  { %v765_v39 = vpop.f32.mrb[6].mxu0 }
 0x172   :  { %v1027_v42 = vpack.c.bf16 %v765_v39, %v761_v32  ;;  %v767_v38 = vpop.f32.mrb[7].mxu0  ;;  %1879 = vmatpush3.bf16.msra.mxu0 %v2303_v63 }
 0x173   :  { %v1028_v44 = vpack.c.bf16 %v767_v38, %v763_v35 }
 0x175   :  { %1826 = vmatprep.subr.bf16.mxu1 %v1028_v44 }
 0x176   :  { %1827 = vmatpush3.bf16.xpose.msra.mxu1 %v1028_v44 }
 0x177   :  { %v771_v49 = vpop.f32.mrb[8].mxu0 }
 0x178   :  { %v773_v52 = vpop.f32.mrb[9].mxu0 }
 0x179   :  { %v775_v54 = vpop.f32.mrb[10].mxu0 }
 0x17a   :  { %v1030_v57 = vpack.c.bf16 %v775_v54, %v771_v49  ;;  %v777_v58 = vpop.f32.mrb[11].mxu0 }
 0x17b   :  { %v1031_v61 = vpack.c.bf16 %v777_v58, %v773_v52 }
 0x17d   :  { %1828 = vmatprep.subr.bf16.mxu1 %v1031_v61 }
 0x17e   :  { %1829 = vmatpush3.bf16.xpose.msra.mxu1 %v1031_v61 }
 0x17f   :  { %v781_v59 = vpop.f32.mrb[12].mxu0 }
 0x180   :  { %v783_v1 = vpop.f32.mrb[13].mxu0 }
 0x181   :  { %v785_v2 = vpop.f32.mrb[14].mxu0 }
 0x182   :  { %v1033_v3 = vpack.c.bf16 %v785_v2, %v781_v59  ;;  %v787_v62 = vpop.f32.mrb[15].mxu0 }
 0x183   :  { %v1034_v4 = vpack.c.bf16 %v787_v62, %v783_v1 }
 0x185   :  { %1830 = vmatprep.subr.bf16.mxu1 %v1034_v4 }
 0x186   :  { %1831 = vmatpush3.bf16.xpose.msra.mxu1 %v1034_v4 }
 0x187   :  { %v2311_v5 = vpop.f32.mrb[16].mxu0  ;;  %1840 = vmatprep.subr.bf16.mxu1 %v2287_v14 }
 0x188   :  { %v793_v6 = vpop.f32.mrb[17].mxu0 }
 0x189   :  { %v2314_v7 = vpop.f32.mrb[18].mxu0 }
 0x18a   :  { %v1036_v8 = vpack.c.bf16 %v2314_v7, %v2311_v5  ;;  %v797_v9 = vpop.f32.mrb[19].mxu0 }
 0x18b   :  { %v2318_v10 = vpack.c.bf16 %v797_v9, %v793_v6 }
 0x18d   :  { %1833 = vmatmul.mubr.bf16.vlgmr.msra.gmra.mrb[48].mxu1 %v1027_v42 }
 0x18e   :  { %1836 = vmatprep.mubr.bf16.mxu1 %v1030_v57  ;;  %1841 = vmatpush3.bf16.msra.mxu1 %v2287_v14 }
 0x18f   :  { %v2321_v11 = vpop.f32.mrb[20].mxu0  ;;  %1842 = vmatprep.subr.bf16.mxu1 %v2285_v13 }
 0x190   :  { %v803_v12 = vpop.f32.mrb[21].mxu0 }
 0x191   :  { %v2324_v15 = vpop.f32.mrb[22].mxu0 }
 0x192   :  { %v1039_v16 = vpack.c.bf16 %v2324_v15, %v2321_v11  ;;  %v807_v17 = vpop.f32.mrb[23].mxu0  ;;  %1843 = vmatpush3.bf16.msra.mxu1 %v2285_v13 }
 0x193   :  { %v2329_v18 = vpack.c.bf16 %v807_v17, %v803_v12  ;;  %1844 = vmatprep.subr.bf16.mxu1 %v2291_v26 }
 0x195   :  { %1837 = vmatmul.mubr.bf16.gmra.mrb[52].mxu1 %v1033_v3 }
 0x196   :  { %1845 = vmatpush3.bf16.msra.mxu1 %v2291_v26  ;;  %v1048_v26 = vlaneseq }
 0x197   :  { %v2333_v14 = vpop.f32.mrb[24].mxu0  ;;  %1846 = vmatprep.subr.bf16.mxu1 %v2289_v30 }
 0x198   :  { %v813_v19 = vpop.f32.mrb[25].mxu0  ;;  %v2352_v31 = vshrl.u32 %v1048_v26, 7  ;;  %v2357_v32 = vand.u32 127, %v1048_v26 }
 0x199   :  { %v2336_v20 = vpop.f32.mrb[26].mxu0 }
 0x19a   :  { %v1042_v21 = vpack.c.bf16 %v2336_v20, %v2333_v14  ;;  %v817_v22 = vpop.f32.mrb[27].mxu0  ;;  %1847 = vmatpush3.bf16.msra.mxu1 %v2289_v30  ;;  %v2355_v30 = vadd.s32 16, %v2352_v31  ;;  %v2360_v33 = vadd.s32 24, %v2352_v31  ;;  %v2363_v34 = vadd.s32 8, %v2352_v31 }
 0x19b   :  { %v2341_v13 = vpack.c.bf16 %v817_v22, %v813_v19  ;;  %1856 = vmatprep.subr.bf16.mxu1 %v2318_v10  ;;  %vm1059_vm2 = vcmp.le.s32.totalorder %v2357_v32, %v2352_v31  ;;  %v2385_v44 = vadd.s32 32, %v2352_v31  ;;  %v2391_v49 = vadd.s32 48, %v2352_v31 }
 0x19c   :  { %vm1061_vm1 = vcmp.le.s32.totalorder %v2357_v32, %v2355_v30  ;;  %vm1062_vm3 = vcmp.le.s32.totalorder %v2357_v32, %v2360_v33  ;;  %vm1060_vm4 = vcmp.le.s32.totalorder %v2357_v32, %v2363_v34  ;;  %v2394_v47 = vadd.s32 40, %v2352_v31 }
 0x19d   :  { %vm1063_vm5 = vcmp.le.s32.totalorder %v2357_v32, %v2385_v44  ;;  %v2401_v50 = vadd.s32 56, %v2352_v31  ;;  %vm1065_vm6 = vcmp.le.s32.totalorder %v2357_v32, %v2391_v49 }
 0x19e   :  { %vm1064_vm7 = vcmp.le.s32.totalorder %v2357_v32, %v2394_v47 }
 0x19f   :  { %v2344_v24 = vpop.f32.mrb[28].mxu0  ;;  %vm1066_vm8 = vcmp.le.s32.totalorder %v2357_v32, %v2401_v50 }
 0x1a0   :  { %v823_v25 = vpop.f32.mrb[29].mxu0 }
 0x1a1   :  { %v2346_v27 = vpop.f32.mrb[30].mxu0 }
 0x1a2   :  { %v1045_v23 = vpack.c.bf16 %v2346_v27, %v2344_v24  ;;  %v827_v28 = vpop.f32.mrb[31].mxu0 }
 0x1a3   :  { %v2350_v29 = vpack.c.bf16 %v827_v28, %v823_v25 }
 0x260   :  { %v1834_v35 = vpop.f32.mrb[48].mxu1 }
 0x261   :  { %v1134_v36 = vsel %vm1061_vm1, %v1834_v35, -1e+30  ;;  %v1101_v37 = vpop.f32.mrb[49].mxu1 }
 0x262   :  { %v1132_v39 = vsel %vm1059_vm2, %v1101_v37, -1e+30  ;;  %v1835_v40 = vpop.f32.mrb[50].mxu1  ;;  %v1146_v41 = vsel %vm579_vm0, %v1134_v36, -inf }
 0x263   :  { %v1135_v42 = vsel %vm1062_vm3, %v1835_v40, -1e+30  ;;  %1147 = vmax.xlane.f32.xlu1 %v1146_v41  ;;  %v1104_v38 = vpop.f32.mrb[51].mxu1  ;;  %v1140_v43 = vsel %vm579_vm0, %v1132_v39, -inf }
 0x264   :  { %v1133_v48 = vsel %vm1060_vm4, %v1104_v38, -1e+30  ;;  %1141 = vmax.xlane.f32.xlu0 %v1140_v43  ;;  %v1149_v51 = vsel %vm579_vm0, %v1135_v42, -inf }
 0x265   :  { %v1143_v52 = vsel %vm579_vm0, %v1133_v48, -inf }
 0x267   :  { %1150 = vmax.xlane.f32.xlu1 %v1149_v51 }
 0x268   :  { %1144 = vmax.xlane.f32.xlu0 %v1143_v52  ;;  %v1838_v53 = vpop.f32.mrb[52].mxu1 }
 0x269   :  { %v1117_v54 = vpop.f32.mrb[53].mxu1  ;;  %v1138_v60 = vsel %vm1065_vm6, %v1838_v53, -1e+30 }
 0x26a   :  { %v1136_v55 = vsel %vm1063_vm5, %v1117_v54, -1e+30  ;;  %v1839_v56 = vpop.f32.mrb[54].mxu1  ;;  %v1158_v2 = vsel %vm579_vm0, %v1138_v60, -inf }
 0x26b   :  { %v1120_v57 = vpop.f32.mrb[55].mxu1  ;;  %v1152_v58 = vsel %vm579_vm0, %v1136_v55, -inf  ;;  %v1139_v1 = vsel %vm1066_vm8, %v1839_v56, -1e+30 }
 0x26c   :  { %v1137_v61 = vsel %vm1064_vm7, %v1120_v57, -1e+30  ;;  %1153 = vmax.xlane.f32.xlu0 %v1152_v58  ;;  %v1161_v3 = vsel %vm579_vm0, %v1139_v1, -inf }
 0x26d   :  { %v1155_v59 = vsel %vm579_vm0, %v1137_v61, -inf }
 0x26e   :  { %1156 = vmax.xlane.f32.xlu1 %v1155_v59 }
 0x270   :  { %1159 = vmax.xlane.f32.xlu0 %v1158_v2 }
 0x272   :  { %1162 = vmax.xlane.f32.xlu1 %v1161_v3 }
 0x2f0   :  { %v1148_v62 = vpop.xlane.xlu1 %1147 }
 0x2f1   :  { %v1166_v4 = vsub.f32 %v1134_v36, %v1148_v62  ;;  %v1142_v6 = vpop.xlane.xlu0 %1141 }
 0x2f2   :  { %v1164_v9 = vsub.f32 %v1132_v39, %v1142_v6 }
 0x2f3   :  { %v1176_v12 = vmul.f32 1.442695, %v1166_v4 }
 0x2f4   :  { %v1172_v17 = vmul.f32 1.442695, %v1164_v9  ;;  %v1151_v19 = vpop.xlane.xlu1 %1150 }
 0x2f5   :  { %v1167_v22 = vsub.f32 %v1135_v42, %v1151_v19  ;;  %v1145_v25 = vpop.xlane.xlu0 %1144 }
 0x2f6   :  { %2047 = vpow2.f32 %v1172_v17  ;;  %v1165_v28 = vsub.f32 %v1133_v48, %v1145_v25 }
 0x2f7   :  { %2049 = vpow2.f32 %v1176_v12  ;;  %v1178_v26 = vmul.f32 1.442695, %v1167_v22 }
 0x2f8   :  { %v1174_v35 = vmul.f32 1.442695, %v1165_v28 }
 0x2f9   :  { %v1154_v37 = vpop.xlane.xlu0 %1153 }
 0x2fa   :  { %2051 = vpow2.f32 %v1174_v35  ;;  %v1168_v40 = vsub.f32 %v1136_v55, %v1154_v37 }
 0x2fb   :  { %v1157_v41 = vpop.xlane.xlu1 %1156  ;;  %2053 = vpow2.f32 %v1178_v26 }
 0x2fc   :  { %v1180_v38 = vmul.f32 1.442695, %v1168_v40  ;;  %v1169_v43 = vsub.f32 %v1137_v61, %v1157_v41 }
 0x2fd   :  { %v1160_v36 = vpop.xlane.xlu0 %1159 }
 0x2fe   :  { %2055 = vpow2.f32 %v1180_v38  ;;  %v1182_v39 = vmul.f32 1.442695, %v1169_v43  ;;  %v1170_v51 = vsub.f32 %v1138_v60, %v1160_v36 }
 0x2ff   :  { %v1163_v52 = vpop.xlane.xlu1 %1162 }
 0x300   :  { %v2048_v53 = vpop.eup %2047  ;;  %2057 = vpow2.f32 %v1182_v39  ;;  %v1184_v42 = vmul.f32 1.442695, %v1170_v51  ;;  %v1171_v54 = vsub.f32 %v1139_v1, %v1163_v52 }
 0x301   :  { %v1188_v48 = vsel %vm579_vm0, %v2048_v53, 0.0  ;;  %v2050_v56 = vpop.eup %2049 }
 0x302   :  { %2059 = vpow2.f32 %v1184_v42  ;;  %v1186_v57 = vmul.f32 1.442695, %v1171_v54  ;;  %1189 = vadd.xlane.f32.xlu0 %v1188_v48  ;;  %v1194_v58 = vsel %vm579_vm0, %v2050_v56, 0.0 }
 0x304   :  { %v2052_v55 = vpop.eup %2051  ;;  %2061 = vpow2.f32 %v1186_v57 }
 0x305   :  { %v1191_v61 = vsel %vm579_vm0, %v2052_v55, 0.0  ;;  %v2054_v59 = vpop.eup %2053 }
 0x306   :  { %1195 = vadd.xlane.f32.xlu0 %v1194_v58  ;;  %1192 = vadd.xlane.f32.xlu1 %v1191_v61  ;;  %v1197_v1 = vsel %vm579_vm0, %v2054_v59, 0.0 }
 0x308   :  { %v2056_v60 = vpop.eup %2055 }
 0x309   :  { %v1200_v2 = vsel %vm579_vm0, %v2056_v60, 0.0 }
 0x30a   :  { %v2058_v3 = vpop.eup %2057  ;;  %1201 = vadd.xlane.f32.xlu0 %v1200_v2  ;;  %1198 = vadd.xlane.f32.xlu1 %v1197_v1 }
 0x30b   :  { %v1203_v6 = vsel %vm579_vm0, %v2058_v3, 0.0 }
 0x30c   :  { %v2060_v62 = vpop.eup %2059 }
 0x30d   :  { %v1206_v4 = vsel %vm579_vm0, %v2060_v62, 0.0 }
 0x30e   :  { %v2062_v9 = vpop.eup %2061  ;;  %1207 = vadd.xlane.f32.xlu0 %v1206_v4  ;;  %1204 = vadd.xlane.f32.xlu1 %v1203_v6 }
 0x30f   :  { %v1209_v12 = vsel %vm579_vm0, %v2062_v9, 0.0 }
 0x312   :  { %1210 = vadd.xlane.f32.xlu1 %v1209_v12 }
 0x38f   :  { %v1190_v17 = vpop.xlane.xlu0 %1189 }
 0x390   :  { %2063 = vrcp.f32 %v1190_v17 }
 0x393   :  { %v1196_v19 = vpop.xlane.xlu0 %1195  ;;  %v1193_v22 = vpop.xlane.xlu1 %1192 }
 0x394   :  { %2065 = vrcp.f32 %v1193_v22 }
 0x395   :  { %2067 = vrcp.f32 %v1196_v19 }
 0x397   :  { %v1202_v25 = vpop.xlane.xlu0 %1201  ;;  %v1199_v28 = vpop.xlane.xlu1 %1198 }
 0x398   :  { %2069 = vrcp.f32 %v1199_v28 }
 0x399   :  { %2071 = vrcp.f32 %v1202_v25 }
 0x39a   :  { %v2064_v37 = vpop.eup %2063 }
 0x39b   :  { %v1208_v26 = vpop.xlane.xlu0 %1207  ;;  %v1205_v35 = vpop.xlane.xlu1 %1204  ;;  %v1220_v38 = vmul.f32 %v2064_v37, %v2048_v53 }
 0x39c   :  { %2073 = vrcp.f32 %v1205_v35 }
 0x39d   :  { %2075 = vrcp.f32 %v1208_v26 }
 0x39e   :  { %v2066_v40 = vpop.eup %2065 }
 0x39f   :  { %v1211_v41 = vpop.xlane.xlu1 %1210  ;;  %v1221_v43 = vmul.f32 %v2066_v40, %v2052_v55  ;;  %v2068_v36 = vpop.eup %2067 }
 0x3a0   :  { %2077 = vrcp.f32 %v1211_v41  ;;  %v1222_v52 = vmul.f32 %v2068_v36, %v2050_v56 }
 0x3a1   :  { %v1228_v39 = vpack.c.bf16 %v1221_v43, %v1220_v38 }
 0x3a2   :  { %v2070_v51 = vpop.eup %2069 }
 0x3a3   :  { %v1223_v42 = vmul.f32 %v2070_v51, %v2054_v59  ;;  %1848 = vmatprep.mubr.msk.bf16.mxu1 %vm579_vm0, %v1228_v39  ;;  %v2072_v54 = vpop.eup %2071 }
 0x3a4   :  { %v1224_v61 = vmul.f32 %v2072_v54, %v2056_v60 }
 0x3a5   :  { %v1229_v48 = vpack.c.bf16 %v1223_v42, %v1222_v52 }
 0x3a6   :  { %v2074_v57 = vpop.eup %2073 }
 0x3a7   :  { %v2076_v58 = vpop.eup %2075  ;;  %1849 = vmatmul.mubr.msk.bf16.vlgmr.msra.gmra.mrb[56].mxu1 %vm579_vm0, %v1229_v48  ;;  %v1225_v2 = vmul.f32 %v2074_v57, %v2058_v3 }
 0x3a8   :  { %1857 = vmatpush3.bf16.xpose.msra.mxu1 %v2318_v10  ;;  %v1226_v55 = vmul.f32 %v2076_v58, %v2060_v62 }
 0x3a9   :  { %1858 = vmatprep.subr.bf16.mxu1 %v2329_v18  ;;  %v1230_v53 = vpack.c.bf16 %v1225_v2, %v1224_v61 }
 0x3aa   :  { %v2078_v1 = vpop.eup %2077 }
 0x3ab   :  { %v1227_v4 = vmul.f32 %v2078_v1, %v2062_v9  ;;  %1852 = vmatprep.mubr.msk.bf16.mxu1 %vm579_vm0, %v1230_v53 }
 0x3ad   :  { %v1231_v56 = vpack.c.bf16 %v1227_v4, %v1226_v55 }
 0x3af   :  { %1853 = vmatmul.mubr.msk.bf16.gmra.mrb[60].mxu1 %vm579_vm0, %v1231_v56 }
 0x3b0   :  { %1859 = vmatpush3.bf16.xpose.msra.mxu1 %v2329_v18  ;;  %1864 = vmatprep.mubr.bf16.mxu1 %v1036_v8 }
 0x3b1   :  { %1860 = vmatprep.subr.bf16.mxu1 %v2341_v13 }
 0x3b8   :  { %1861 = vmatpush3.bf16.xpose.msra.mxu1 %v2341_v13 }
 0x3b9   :  { %1862 = vmatprep.subr.bf16.mxu1 %v2350_v29 }
 0x3c0   :  { %1863 = vmatpush3.bf16.xpose.msra.mxu1 %v2350_v29 }
 0x3c1   :  { %1888 = vmatprep.subr.bf16.mxu1 %v2295_v46 }
 0x3c7   :  { %1865 = vmatmul.mubr.bf16.vlgmr.msra.gmra.mrb[64].mxu1 %v1039_v16 }
 0x3c8   :  { %1868 = vmatprep.mubr.bf16.mxu1 %v1042_v21  ;;  %1892 = vmatpush3.bf16.msra.mxu1 %v2295_v46 }
 0x3c9   :  { %1889 = vmatprep.subr.bf16.mxu1 %v2293_v45 }
 0x3cc   :  { %1893 = vmatpush3.bf16.msra.mxu1 %v2293_v45 }
 0x3cd   :  { %1890 = vmatprep.subr.bf16.mxu1 %v2305_v0 }
 0x3cf   :  { %1869 = vmatmul.mubr.bf16.gmra.mrb[68].mxu1 %v1045_v23 }
 0x3d0   :  { %1894 = vmatpush3.bf16.msra.mxu1 %v2305_v0 }
 0x3d1   :  { %1891 = vmatprep.subr.bf16.mxu1 %v2303_v63 }
 0x3d4   :  { %1895 = vmatpush3.bf16.msra.mxu1 %v2303_v63 }
 0x47a   :  { %v1850_v5 = vpop.f32.mrb[56].mxu1 }
 0x47b   :  { %1311 = vst [vmem:[#allocation5 + $0x10] sm:$0xff] %v1850_v5  ;;  %v1278_v7 = vpop.f32.mrb[57].mxu1 }
 0x47c   :  { %1309 = vst [vmem:[#allocation5] sm:$0xff] %v1278_v7  ;;  %v1851_v46 = vpop.f32.mrb[58].mxu1 }
 0x47d   :  { %1312 = vst [vmem:[#allocation5 + $0x18] sm:$0xff] %v1851_v46  ;;  %v1281_v8 = vpop.f32.mrb[59].mxu1 }
 0x47e   :  { %1310 = vst [vmem:[#allocation5 + $0x8] sm:$0xff] %v1281_v8 }
 0x482   :  { %v1854_v45 = vpop.f32.mrb[60].mxu1 }
 0x483   :  { %1315 = vst [vmem:[#allocation5 + $0x30] sm:$0xff] %v1854_v45  ;;  %v1294_v10 = vpop.f32.mrb[61].mxu1 }
 0x484   :  { %1313 = vst [vmem:[#allocation5 + $0x20] sm:$0xff] %v1294_v10  ;;  %v1855_v11 = vpop.f32.mrb[62].mxu1 }
 0x485   :  { %1316 = vst [vmem:[#allocation5 + $0x38] sm:$0xff] %v1855_v11  ;;  %v1297_v15 = vpop.f32.mrb[63].mxu1 }
 0x486   :  { %1314 = vst [vmem:[#allocation5 + $0x28] sm:$0xff] %v1297_v15 }
 0x49a   :  { %v1866_v0 = vpop.f32.mrb[64].mxu1 }
 0x49b   :  { %v1384_v63 = vsel %vm1061_vm1, %v1866_v0, -1e+30  ;;  %v1351_v16 = vpop.f32.mrb[65].mxu1 }
 0x49c   :  { %v1867_v18 = vpop.f32.mrb[66].mxu1  ;;  %v1396_v14 = vsel %vm579_vm0, %v1384_v63, -inf  ;;  %v1382_v20 = vsel %vm1059_vm2, %v1351_v16, -1e+30 }
 0x49d   :  { %v1385_v21 = vsel %vm1062_vm3, %v1867_v18, -1e+30  ;;  %1397 = vmax.xlane.f32.xlu0 %v1396_v14  ;;  %v1354_v13 = vpop.f32.mrb[67].mxu1  ;;  %v1390_v23 = vsel %vm579_vm0, %v1382_v20, -inf }
 0x49e   :  { %v1399_v24 = vsel %vm579_vm0, %v1385_v21, -inf  ;;  %v1383_v27 = vsel %vm1060_vm4, %v1354_v13, -1e+30 }
 0x49f   :  { %1400 = vmax.xlane.f32.xlu1 %v1399_v24  ;;  %v1393_v31 = vsel %vm579_vm0, %v1383_v27, -inf }
 0x4a1   :  { %1391 = vmax.xlane.f32.xlu0 %v1390_v23 }
 0x4a2   :  { %v1870_v29 = vpop.f32.mrb[68].mxu1 }
 0x4a3   :  { %1394 = vmax.xlane.f32.xlu1 %v1393_v31  ;;  %v1367_v30 = vpop.f32.mrb[69].mxu1  ;;  %v1388_v34 = vsel %vm1065_vm6, %v1870_v29, -1e+30 }
 0x4a4   :  { %v1386_v33 = vsel %vm1063_vm5, %v1367_v30, -1e+30  ;;  %v1871_v59 = vpop.f32.mrb[70].mxu1  ;;  %v1408_v9 = vsel %vm579_vm0, %v1388_v34, -inf }
 0x4a5   :  { %v1370_v60 = vpop.f32.mrb[71].mxu1  ;;  %v1402_v3 = vsel %vm579_vm0, %v1386_v33, -inf  ;;  %v1389_v44 = vsel %vm1066_vm8, %v1871_v59, -1e+30 }
 0x4a6   :  { %v1387_v62 = vsel %vm1064_vm7, %v1370_v60, -1e+30  ;;  %1403 = vmax.xlane.f32.xlu0 %v1402_v3  ;;  %v1411_v12 = vsel %vm579_vm0, %v1389_v44, -inf }
 0x4a7   :  { %v1405_v6 = vsel %vm579_vm0, %v1387_v62, -inf }
 0x4a8   :  { %1406 = vmax.xlane.f32.xlu1 %v1405_v6 }
 0x4aa   :  { %1409 = vmax.xlane.f32.xlu0 %v1408_v9 }
 0x4ac   :  { %1412 = vmax.xlane.f32.xlu1 %v1411_v12 }
 0x52a   :  { %v1398_v49 = vpop.xlane.xlu0 %1397 }
 0x52b   :  { %v1416_v17 = vsub.f32 %v1384_v63, %v1398_v49 }
 0x52c   :  { %v1401_v19 = vpop.xlane.xlu1 %1400 }
 0x52d   :  { %v1426_v22 = vmul.f32 1.442695, %v1416_v17  ;;  %v1417_v47 = vsub.f32 %v1385_v21, %v1401_v19 }
 0x52e   :  { %v1392_v25 = vpop.xlane.xlu0 %1391 }
 0x52f   :  { %2079 = vpow2.f32 %v1426_v22  ;;  %v1428_v28 = vmul.f32 1.442695, %v1417_v47  ;;  %v1414_v26 = vsub.f32 %v1382_v20, %v1392_v25 }
 0x530   :  { %v1395_v35 = vpop.xlane.xlu1 %1394 }
 0x531   :  { %2081 = vpow2.f32 %v1428_v28  ;;  %v1422_v32 = vmul.f32 1.442695, %v1414_v26  ;;  %v1415_v50 = vsub.f32 %v1383_v27, %v1395_v35 }
 0x533   :  { %2083 = vpow2.f32 %v1422_v32  ;;  %v1424_v37 = vmul.f32 1.442695, %v1415_v50  ;;  %v1404_v40 = vpop.xlane.xlu0 %1403 }
 0x534   :  { %v1418_v41 = vsub.f32 %v1386_v33, %v1404_v40 }
 0x535   :  { %2085 = vpow2.f32 %v1424_v37  ;;  %v1407_v38 = vpop.xlane.xlu1 %1406 }
 0x536   :  { %v1430_v43 = vmul.f32 1.442695, %v1418_v41  ;;  %v1419_v36 = vsub.f32 %v1387_v62, %v1407_v38 }
 0x537   :  { %v1410_v39 = vpop.xlane.xlu0 %1409 }
 0x538   :  { %2087 = vpow2.f32 %v1430_v43  ;;  %v1432_v51 = vmul.f32 1.442695, %v1419_v36  ;;  %v1420_v52 = vsub.f32 %v1388_v34, %v1410_v39 }
 0x539   :  { %v2080_v42 = vpop.eup %2079  ;;  %v1413_v54 = vpop.xlane.xlu1 %1412 }
 0x53a   :  { %2089 = vpow2.f32 %v1432_v51  ;;  %v1434_v48 = vmul.f32 1.442695, %v1420_v52  ;;  %v1421_v57 = vsub.f32 %v1389_v44, %v1413_v54  ;;  %v1444_v58 = vsel %vm579_vm0, %v2080_v42, 0.0 }
 0x53b   :  { %v2082_v61 = vpop.eup %2081  ;;  %1445 = vadd.xlane.f32.xlu0 %v1444_v58 }
 0x53c   :  { %2091 = vpow2.f32 %v1434_v48  ;;  %v1436_v2 = vmul.f32 1.442695, %v1421_v57  ;;  %v1447_v1 = vsel %vm579_vm0, %v2082_v61, 0.0 }
 0x53d   :  { %v2084_v53 = vpop.eup %2083  ;;  %1448 = vadd.xlane.f32.xlu1 %v1447_v1 }
 0x53e   :  { %2093 = vpow2.f32 %v1436_v2  ;;  %v1438_v55 = vsel %vm579_vm0, %v2084_v53, 0.0 }
 0x53f   :  { %v2086_v4 = vpop.eup %2085  ;;  %1439 = vadd.xlane.f32.xlu0 %v1438_v55 }
 0x540   :  { %v1441_v56 = vsel %vm579_vm0, %v2086_v4, 0.0 }
 0x541   :  { %1442 = vadd.xlane.f32.xlu1 %v1441_v56 }
 0x542   :  { %v2088_v5 = vpop.eup %2087 }
 0x543   :  { %v1450_v7 = vsel %vm579_vm0, %v2088_v5, 0.0 }
 0x544   :  { %v2090_v46 = vpop.eup %2089  ;;  %1451 = vadd.xlane.f32.xlu0 %v1450_v7 }
 0x545   :  { %v1453_v8 = vsel %vm579_vm0, %v2090_v46, 0.0 }
 0x546   :  { %v2092_v45 = vpop.eup %2091  ;;  %1454 = vadd.xlane.f32.xlu1 %v1453_v8 }
 0x547   :  { %v1456_v10 = vsel %vm579_vm0, %v2092_v45, 0.0 }
 0x548   :  { %v2094_v11 = vpop.eup %2093  ;;  %1457 = vadd.xlane.f32.xlu0 %v1456_v10 }
 0x549   :  { %v1459_v15 = vsel %vm579_vm0, %v2094_v11, 0.0 }
 0x54a   :  { %1460 = vadd.xlane.f32.xlu1 %v1459_v15 }
 0x5c8   :  { %v1446_v0 = vpop.xlane.xlu0 %1445 }
 0x5ca   :  { %v1449_v63 = vpop.xlane.xlu1 %1448 }
 0x5cb   :  { %2095 = vrcp.f32 %v1449_v63 }
 0x5cc   :  { %v1440_v16 = vpop.xlane.xlu0 %1439 }
 0x5cd   :  { %2097 = vrcp.f32 %v1440_v16 }
 0x5ce   :  { %2099 = vrcp.f32 %v1446_v0  ;;  %v1443_v18 = vpop.xlane.xlu1 %1442 }
 0x5cf   :  { %2101 = vrcp.f32 %v1443_v18 }
 0x5d1   :  { %v1452_v14 = vpop.xlane.xlu0 %1451 }
 0x5d2   :  { %2103 = vrcp.f32 %v1452_v14 }
 0x5d3   :  { %v1455_v20 = vpop.xlane.xlu1 %1454 }
 0x5d4   :  { %2105 = vrcp.f32 %v1455_v20 }
 0x5d5   :  { %v1458_v21 = vpop.xlane.xlu0 %1457  ;;  %v2096_v13 = vpop.eup %2095 }
 0x5d6   :  { %2107 = vrcp.f32 %v1458_v21  ;;  %v1473_v31 = vmul.f32 %v2096_v13, %v2082_v61 }
 0x5d7   :  { %v2098_v24 = vpop.eup %2097  ;;  %v1461_v27 = vpop.xlane.xlu1 %1460 }
 0x5d8   :  { %v2100_v23 = vpop.eup %2099  ;;  %2109 = vrcp.f32 %v1461_v27  ;;  %v1470_v30 = vmul.f32 %v2098_v24, %v2084_v53 }
 0x5d9   :  { %v2102_v29 = vpop.eup %2101  ;;  %v1472_v59 = vmul.f32 %v2100_v23, %v2080_v42 }
 0x5da   :  { %v1471_v33 = vmul.f32 %v2102_v29, %v2086_v4 }
 0x5db   :  { %v1479_v34 = vpack.c.bf16 %v1473_v31, %v1472_v59 }
 0x5dc   :  { %v2104_v60 = vpop.eup %2103  ;;  %v1478_v3 = vpack.c.bf16 %v1471_v33, %v1470_v30 }
 0x5dd   :  { %v1474_v6 = vmul.f32 %v2104_v60, %v2088_v5 }
 0x5de   :  { %v2106_v62 = vpop.eup %2105  ;;  %1880 = vmatprep.mubr.msk.bf16.mxu0 %vm579_vm0, %v1478_v3 }
 0x5df   :  { %1881 = vmatmul.mubr.msk.bf16.vlgmr.msra.gmra.mrb[32].mxu0 %vm579_vm0, %v1479_v34  ;;  %v1475_v44 = vmul.f32 %v2106_v62, %v2090_v46 }
 0x5e0   :  { %v2108_v9 = vpop.eup %2107 }
 0x5e1   :  { %v1480_v12 = vpack.c.bf16 %v1475_v44, %v1474_v6  ;;  %v1476_v17 = vmul.f32 %v2108_v9, %v2092_v45 }
 0x5e2   :  { %v2110_v49 = vpop.eup %2109 }
 0x5e3   :  { %v1477_v19 = vmul.f32 %v2110_v49, %v2094_v11  ;;  %1884 = vmatprep.mubr.msk.bf16.mxu1 %vm579_vm0, %v1480_v12 }
 0x5e5   :  { %v1481_v22 = vpack.c.bf16 %v1477_v19, %v1476_v17 }
 0x5e7   :  { %1885 = vmatmul.mubr.msk.bf16.vlgmr.msra.gmra.mrb[72].mxu1 %vm579_vm0, %v1481_v22 }
 0x6b2   :  { %v1882_v47 = vpop.f32.mrb[32].mxu0 }
 0x6b3   :  { %1561 = vst [vmem:[#allocation5 + $0x50] sm:$0xff] %v1882_v47  ;;  %v1528_v25 = vpop.f32.mrb[33].mxu0 }
 0x6b4   :  { %1559 = vst [vmem:[#allocation5 + $0x40] sm:$0xff] %v1528_v25  ;;  %v1883_v28 = vpop.f32.mrb[34].mxu0 }
 0x6b5   :  { %1562 = vst [vmem:[#allocation5 + $0x58] sm:$0xff] %v1883_v28  ;;  %v1531_v26 = vpop.f32.mrb[35].mxu0 }
 0x6b6   :  { %1560 = vst [vmem:[#allocation5 + $0x48] sm:$0xff] %v1531_v26 }
 0x6ba   :  { %v1886_v35 = vpop.f32.mrb[72].mxu1 }
 0x6bb   :  { %1565 = vst [vmem:[#allocation5 + $0x70] sm:$0xff] %v1886_v35  ;;  %v1544_v32 = vpop.f32.mrb[73].mxu1 }
 0x6bc   :  { %1563 = vst [vmem:[#allocation5 + $0x60] sm:$0xff] %v1544_v32  ;;  %v1887_v50 = vpop.f32.mrb[74].mxu1 }
 0x6bd   :  { %1566 = vst [vmem:[#allocation5 + $0x78] sm:$0xff] %v1887_v50  ;;  %v1547_v37 = vpop.f32.mrb[75].mxu1 }
 0x6be   :  { %1564 = vst [vmem:[#allocation5 + $0x68] sm:$0xff] %v1547_v37 }
 0x6bf   :  { %2144 = shalt.err (!%p2141_p12)
}
 0x6c0   :  { %s2145_s17 = scalar_lea.hbm %s2522_s2, 2048 }
 0x6c1   :  { %p2146_p13 = scmp.ne.s32.totalorder %s2522_s2, %s2145_s17  ;;  %p2149_p0 = scmp.lt.u32.totalorder %s2145_s17, %s2522_s2 }
 0x6c3   :  { %p2151_p1 = pnand %p2149_p0, %p2146_p13 }
 0x6c5   :  { %2154 = shalt.err (!%p2151_p1)
}
 0x6c6   :  { %s2164_s22 = smov 128   ;;  %s2165_s1 = smov 8  }
 0x6c7   :  { %1578 = dma.vmem_to_hbm [thread:$0]  %s1573_s13, 2048, %s2522_s2, [#allocation4], %s2164_s22, %s2164_s22, %s2165_s1  }
 0x6c8   :  { %2157 = dma.done.wait [#allocation4], 2048  }
 0x6c9   :  { %2158 = vsyncadd [#allocation4], 4294965248 }
 0x6ca   :  { %1582 = vsyncpa [#allocation3], 1 }
 0x6cb   :  { %1583 = vsyncpa [#allocation4], 1 }

</bundles_post_ra>
